<compile_context>
chip_gen: v6e
topology: v6e:2x2x1
jax: 0.10.0
libtpu: 0.0.40
codegen_flags: <defaults>
</compile_context>

<pallas_src>
import math

import jax
import jax.numpy as jnp
from jax import lax
from jax.experimental import pallas as pl
from jax.experimental.pallas import tpu as pltpu


def slide_net_kernel(vals_ref, in_idx_ref, out_idx_ref, b2_ref,   # SMEM (scalars)
                     w1t_ref, b1_ref, w2_ref,                     # VMEM
                     out_ref,                                     # VMEM [B, n_out_pad]
                     w2g_ref):                                    # VMEM scratch [n_out_pad, hidden]
    B, n_in = vals_ref.shape
    n_out = out_idx_ref.shape[1]
    n_out_pad = out_ref.shape[1]

    # Zero the gathered-weight scratch once so the padded output lanes are exact zeros.
    w2g_ref[...] = jnp.zeros_like(w2g_ref)

    lane_iota = lax.broadcasted_iota(jnp.int32, (1, n_out_pad), 1)
    sub_iota = lax.broadcasted_iota(jnp.int32, out_ref.shape, 0)
    out_acc = jnp.zeros(out_ref.shape, jnp.float32)

    for b in range(B):                       # B is tiny & static -> unrolled
        # ---- layer 1: sparse gather-accumulate straight into the hidden row ----
        # h[h'] = b1[h'] + sum_i vals[b,i] * W1t[in_idx[b,i], h']   (W1t = W1.T)
        h = b1_ref[...]                      # [1, hidden] f32
        for i in range(n_in):
            idx = in_idx_ref[b, i]           # SMEM scalar (i32)
            v = vals_ref[b, i]               # SMEM scalar (f32)
            h = h + v * w1t_ref[pl.ds(idx, 1), :]   # dynamic row gather, VPU FMA
        h = jnp.maximum(h, 0.0)              # ReLU

        # ---- layer 2: gather only the active class rows, one small MXU matmul ----
        bias = jnp.zeros((1, n_out_pad), jnp.float32)
        for j in range(n_out):
            cls = out_idx_ref[b, j]                              # SMEM scalar (i32)
            w2g_ref[pl.ds(j, 1), :] = w2_ref[pl.ds(cls, 1), :]   # gather W2[cls, :]
            bias = bias + jnp.where(lane_iota == j, b2_ref[cls], 0.0)

        # [1, hidden] @ [hidden, n_out_pad] -> [1, n_out_pad]  (padding rows are zero)
        z = jnp.dot(h, w2g_ref[...].T, preferred_element_type=jnp.float32) + bias
        out_acc = out_acc + jnp.where(sub_iota == b, z, 0.0)

    # ONE full lane-dense store (n_out_pad is a multiple of 128).
    out_ref[...] = out_acc


def slide_net_forward(in_values, active_in_indices, active_label_indices,
                      W1, b1, W2, b2):
    """Pallas forward pass of Net. Returns (val2, ind2)."""
    B, n_out = active_label_indices.shape
    hidden = W1.shape[0]
    n_out_pad = ((n_out + 127) // 128) * 128   # lane-dense output slab

    # Glue: W1 presented transposed ([feat, hidden]) so a class/feature gather is a
    # row (sublane) gather; W2 stays [n_classes, hidden] for the same reason.
    W1t = jnp.asarray(W1, jnp.float32).T
    W2m = jnp.asarray(W2, jnp.float32)
    b1r = jnp.asarray(b1, jnp.float32).reshape(1, -1)
    b2v = jnp.asarray(b2, jnp.float32)

    smem = pl.BlockSpec(memory_space=pltpu.MemorySpace.SMEM)
    vmem = pl.BlockSpec(memory_space=pltpu.MemorySpace.VMEM)

    out_pad = pl.pallas_call(
        slide_net_kernel,
        out_shape=jax.ShapeDtypeStruct((B, n_out_pad), jnp.float32),
        in_specs=[smem, smem, smem, smem, vmem, vmem, vmem],
        out_specs=vmem,
        scratch_shapes=[pltpu.VMEM((n_out_pad, hidden), jnp.float32)],
    )(jnp.asarray(in_values, jnp.float32),
      jnp.asarray(active_in_indices, jnp.int32),
      jnp.asarray(active_label_indices, jnp.int32),
      b2v, W1t, b1r, W2m)

    return out_pad[:, :n_out], active_label_indices


def ref_forward(in_values, active_in_indices, active_label_indices, W1, b1, W2, b2):
    """Pure-JAX reference with identical semantics (full f32 precision)."""
    hi = jax.lax.Precision.HIGHEST
    # slide1 dense: val1[b,h] = sum_i vals[b,i] * W1[h, idx[b,i]] + b1[h]
    W1g = W1[:, active_in_indices]                                  # [H, B, Nin]
    val1 = jnp.einsum('hbi,bi->bh', W1g, in_values, precision=hi) + b1[None, :]
    val1 = jnp.maximum(val1, 0.0)
    z = jnp.dot(val1, W2.T, precision=hi) + b2[None, :]             # [B, C]
    val2 = jnp.take_along_axis(z, active_label_indices, axis=1)
    return val2, active_label_indices


def trunc_normal(key, shape, std):
    return jax.random.truncated_normal(key, -2.0, 2.0, shape, jnp.float32) * std


if __name__ == "__main__":
    # Small shapes consistent with the module's forward.
    feature_dim, hidden_dim, n_classes = 128, 32, 16
    batch, n_active_in, n_active_out = 2, 8, 4

    key = jax.random.PRNGKey(0)
    k_w1, k_b1, k_w2, k_b2, k_v, k_ii, k_oi = jax.random.split(key, 7)

    std1 = 2.0 / math.sqrt(feature_dim + hidden_dim)
    std2 = 2.0 / math.sqrt(hidden_dim + n_classes)
    W1 = trunc_normal(k_w1, (hidden_dim, feature_dim), std1)   # nn.Linear(feat, hidden).weight
    b1 = trunc_normal(k_b1, (hidden_dim,), std1)
    W2 = trunc_normal(k_w2, (n_classes, hidden_dim), std2)     # nn.Linear(hidden, classes).weight
    b2 = trunc_normal(k_b2, (n_classes,), std2)

    in_values = jax.random.normal(k_v, (batch, n_active_in), jnp.float32)
    active_in_indices = jax.random.randint(k_ii, (batch, n_active_in), 0, feature_dim,
                                           dtype=jnp.int32)
    active_label_indices = jax.random.randint(k_oi, (batch, n_active_out), 0, n_classes,
                                              dtype=jnp.int32)

    val2, ind2 = slide_net_forward(in_values, active_in_indices, active_label_indices,
                                   W1, b1, W2, b2)
    val2 = jax.block_until_ready(val2)

    ref_val2, ref_ind2 = ref_forward(in_values, active_in_indices, active_label_indices,
                                     W1, b1, W2, b2)

    assert val2.shape == (batch, n_active_out)
    assert jnp.allclose(val2, ref_val2, atol=1e-4, rtol=1e-4), (val2, ref_val2)
    assert jnp.array_equal(ind2, ref_ind2)
    print("KERNEL_OK")
</pallas_src>

<mosaic_0001>
module attributes {stable_mosaic.version = 11 : i64} {
  func.func @slide_net_kernel(%arg0: memref<2x8xf32, #tpu.memory_space<smem>>, %arg1: memref<2x8xi32, #tpu.memory_space<smem>>, %arg2: memref<2x4xi32, #tpu.memory_space<smem>>, %arg3: memref<16xf32, #tpu.memory_space<smem>>, %arg4: memref<128x32xf32, #tpu.memory_space<vmem>>, %arg5: memref<1x32xf32, #tpu.memory_space<vmem>>, %arg6: memref<16x32xf32, #tpu.memory_space<vmem>>, %arg7: memref<2x128xf32, #tpu.memory_space<vmem>>, %arg8: memref<128x32xf32, #tpu.memory_space<vmem>>) attributes {dimension_semantics = [], scalar_prefetch = 0 : i64, scratch_operands = 1 : i64, tpu.core_type = #tpu.core_type<tc>} {
    %cst = arith.constant 0.000000e+00 : f32
    %0 = vector.broadcast %cst : f32 to vector<128x32xf32>
    %c0 = arith.constant 0 : index
    %c0_0 = arith.constant 0 : index
    %1 = vector.load %arg8[%c0, %c0_0] : memref<128x32xf32, #tpu.memory_space<vmem>>, vector<128x32xf32>
    tpu.vector_store %arg8[%c0, %c0_0], %0 {strides = array<i32>} : memref<128x32xf32, #tpu.memory_space<vmem>>, vector<128x32xf32>,
    %2 = tpu.iota {dimensions = array<i32: 1>} : vector<1x128xi32>
    %3 = tpu.iota {dimensions = array<i32: 0>} : vector<2x128xi32>
    %cst_1 = arith.constant 0.000000e+00 : f32
    %4 = vector.broadcast %cst_1 : f32 to vector<2x128xf32>
    %c0_2 = arith.constant 0 : index
    %c0_3 = arith.constant 0 : index
    %5 = vector.load %arg5[%c0_2, %c0_3] : memref<1x32xf32, #tpu.memory_space<vmem>>, vector<1x32xf32>
    %c0_4 = arith.constant 0 : index
    %c0_5 = arith.constant 0 : index
    %6 = memref.load %arg1[%c0_4, %c0_5] : memref<2x8xi32, #tpu.memory_space<smem>>
    %c0_6 = arith.constant 0 : index
    %c0_7 = arith.constant 0 : index
    %7 = memref.load %arg0[%c0_6, %c0_7] : memref<2x8xf32, #tpu.memory_space<smem>>
    %8 = arith.index_cast %6 : i32 to index
    %c0_8 = arith.constant 0 : index
    %9 = vector.load %arg4[%8, %c0_8] : memref<128x32xf32, #tpu.memory_space<vmem>>, vector<1x32xf32>
    %10 = vector.broadcast %7 : f32 to vector<1x32xf32>
    %11 = arith.mulf %10, %9 : vector<1x32xf32>
    %12 = arith.addf %5, %11 : vector<1x32xf32>
    %c0_9 = arith.constant 0 : index
    %c1 = arith.constant 1 : index
    %13 = memref.load %arg1[%c0_9, %c1] : memref<2x8xi32, #tpu.memory_space<smem>>
    %c0_10 = arith.constant 0 : index
    %c1_11 = arith.constant 1 : index
    %14 = memref.load %arg0[%c0_10, %c1_11] : memref<2x8xf32, #tpu.memory_space<smem>>
    %15 = arith.index_cast %13 : i32 to index
    %c0_12 = arith.constant 0 : index
    %16 = vector.load %arg4[%15, %c0_12] : memref<128x32xf32, #tpu.memory_space<vmem>>, vector<1x32xf32>
    %17 = vector.broadcast %14 : f32 to vector<1x32xf32>
    %18 = arith.mulf %17, %16 : vector<1x32xf32>
    %19 = arith.addf %12, %18 : vector<1x32xf32>
    %c0_13 = arith.constant 0 : index
    %c2 = arith.constant 2 : index
    %20 = memref.load %arg1[%c0_13, %c2] : memref<2x8xi32, #tpu.memory_space<smem>>
    %c0_14 = arith.constant 0 : index
    %c2_15 = arith.constant 2 : index
    %21 = memref.load %arg0[%c0_14, %c2_15] : memref<2x8xf32, #tpu.memory_space<smem>>
    %22 = arith.index_cast %20 : i32 to index
    %c0_16 = arith.constant 0 : index
    %23 = vector.load %arg4[%22, %c0_16] : memref<128x32xf32, #tpu.memory_space<vmem>>, vector<1x32xf32>
    %24 = vector.broadcast %21 : f32 to vector<1x32xf32>
    %25 = arith.mulf %24, %23 : vector<1x32xf32>
    %26 = arith.addf %19, %25 : vector<1x32xf32>
    %c0_17 = arith.constant 0 : index
    %c3 = arith.constant 3 : index
    %27 = memref.load %arg1[%c0_17, %c3] : memref<2x8xi32, #tpu.memory_space<smem>>
    %c0_18 = arith.constant 0 : index
    %c3_19 = arith.constant 3 : index
    %28 = memref.load %arg0[%c0_18, %c3_19] : memref<2x8xf32, #tpu.memory_space<smem>>
    %29 = arith.index_cast %27 : i32 to index
    %c0_20 = arith.constant 0 : index
    %30 = vector.load %arg4[%29, %c0_20] : memref<128x32xf32, #tpu.memory_space<vmem>>, vector<1x32xf32>
    %31 = vector.broadcast %28 : f32 to vector<1x32xf32>
    %32 = arith.mulf %31, %30 : vector<1x32xf32>
    %33 = arith.addf %26, %32 : vector<1x32xf32>
    %c0_21 = arith.constant 0 : index
    %c4 = arith.constant 4 : index
    %34 = memref.load %arg1[%c0_21, %c4] : memref<2x8xi32, #tpu.memory_space<smem>>
    %c0_22 = arith.constant 0 : index
    %c4_23 = arith.constant 4 : index
    %35 = memref.load %arg0[%c0_22, %c4_23] : memref<2x8xf32, #tpu.memory_space<smem>>
    %36 = arith.index_cast %34 : i32 to index
    %c0_24 = arith.constant 0 : index
    %37 = vector.load %arg4[%36, %c0_24] : memref<128x32xf32, #tpu.memory_space<vmem>>, vector<1x32xf32>
    %38 = vector.broadcast %35 : f32 to vector<1x32xf32>
    %39 = arith.mulf %38, %37 : vector<1x32xf32>
    %40 = arith.addf %33, %39 : vector<1x32xf32>
    %c0_25 = arith.constant 0 : index
    %c5 = arith.constant 5 : index
    %41 = memref.load %arg1[%c0_25, %c5] : memref<2x8xi32, #tpu.memory_space<smem>>
    %c0_26 = arith.constant 0 : index
    %c5_27 = arith.constant 5 : index
    %42 = memref.load %arg0[%c0_26, %c5_27] : memref<2x8xf32, #tpu.memory_space<smem>>
    %43 = arith.index_cast %41 : i32 to index
    %c0_28 = arith.constant 0 : index
    %44 = vector.load %arg4[%43, %c0_28] : memref<128x32xf32, #tpu.memory_space<vmem>>, vector<1x32xf32>
    %45 = vector.broadcast %42 : f32 to vector<1x32xf32>
    %46 = arith.mulf %45, %44 : vector<1x32xf32>
    %47 = arith.addf %40, %46 : vector<1x32xf32>
    %c0_29 = arith.constant 0 : index
    %c6 = arith.constant 6 : index
    %48 = memref.load %arg1[%c0_29, %c6] : memref<2x8xi32, #tpu.memory_space<smem>>
    %c0_30 = arith.constant 0 : index
    %c6_31 = arith.constant 6 : index
    %49 = memref.load %arg0[%c0_30, %c6_31] : memref<2x8xf32, #tpu.memory_space<smem>>
    %50 = arith.index_cast %48 : i32 to index
    %c0_32 = arith.constant 0 : index
    %51 = vector.load %arg4[%50, %c0_32] : memref<128x32xf32, #tpu.memory_space<vmem>>, vector<1x32xf32>
    %52 = vector.broadcast %49 : f32 to vector<1x32xf32>
    %53 = arith.mulf %52, %51 : vector<1x32xf32>
    %54 = arith.addf %47, %53 : vector<1x32xf32>
    %c0_33 = arith.constant 0 : index
    %c7 = arith.constant 7 : index
    %55 = memref.load %arg1[%c0_33, %c7] : memref<2x8xi32, #tpu.memory_space<smem>>
    %c0_34 = arith.constant 0 : index
    %c7_35 = arith.constant 7 : index
    %56 = memref.load %arg0[%c0_34, %c7_35] : memref<2x8xf32, #tpu.memory_space<smem>>
    %57 = arith.index_cast %55 : i32 to index
    %c0_36 = arith.constant 0 : index
    %58 = vector.load %arg4[%57, %c0_36] : memref<128x32xf32, #tpu.memory_space<vmem>>, vector<1x32xf32>
    %59 = vector.broadcast %56 : f32 to vector<1x32xf32>
    %60 = arith.mulf %59, %58 : vector<1x32xf32>
    %61 = arith.addf %54, %60 : vector<1x32xf32>
    %cst_37 = arith.constant 0.000000e+00 : f32
    %62 = vector.broadcast %cst_37 : f32 to vector<1x32xf32>
    %63 = arith.maximumf %61, %62 : vector<1x32xf32>
    %cst_38 = arith.constant 0.000000e+00 : f32
    %64 = vector.broadcast %cst_38 : f32 to vector<1x128xf32>
    %c0_39 = arith.constant 0 : index
    %c0_40 = arith.constant 0 : index
    %65 = memref.load %arg2[%c0_39, %c0_40] : memref<2x4xi32, #tpu.memory_space<smem>>
    %66 = arith.index_cast %65 : i32 to index
    %c0_41 = arith.constant 0 : index
    %67 = vector.load %arg6[%66, %c0_41] : memref<16x32xf32, #tpu.memory_space<vmem>>, vector<1x32xf32>
    %c0_42 = arith.constant 0 : index
    %c0_43 = arith.constant 0 : index
    %68 = vector.load %arg8[%c0_42, %c0_43] : memref<128x32xf32, #tpu.memory_space<vmem>>, vector<1x32xf32>
    tpu.vector_store %arg8[%c0_42, %c0_43], %67 {strides = array<i32>} : memref<128x32xf32, #tpu.memory_space<vmem>>, vector<1x32xf32>,
    %c0_i32 = arith.constant 0 : i32
    %69 = vector.broadcast %c0_i32 : i32 to vector<1x128xi32>
    %70 = arith.cmpi eq, %2, %69 : vector<1x128xi32>
    %71 = arith.index_cast %65 : i32 to index
    %72 = memref.load %arg3[%71] : memref<16xf32, #tpu.memory_space<smem>>
    %cst_44 = arith.constant 0.000000e+00 : f32
    %73 = vector.broadcast %72 : f32 to vector<1x128xf32>
    %74 = vector.broadcast %cst_44 : f32 to vector<1x128xf32>
    %75 = arith.select %70, %73, %74 : vector<1x128xi1>, vector<1x128xf32>
    %76 = arith.addf %64, %75 : vector<1x128xf32>
    %c0_45 = arith.constant 0 : index
    %c1_46 = arith.constant 1 : index
    %77 = memref.load %arg2[%c0_45, %c1_46] : memref<2x4xi32, #tpu.memory_space<smem>>
    %78 = arith.index_cast %77 : i32 to index
    %c0_47 = arith.constant 0 : index
    %79 = vector.load %arg6[%78, %c0_47] : memref<16x32xf32, #tpu.memory_space<vmem>>, vector<1x32xf32>
    %c1_48 = arith.constant 1 : index
    %c0_49 = arith.constant 0 : index
    %80 = vector.load %arg8[%c1_48, %c0_49] : memref<128x32xf32, #tpu.memory_space<vmem>>, vector<1x32xf32>
    tpu.vector_store %arg8[%c1_48, %c0_49], %79 {strides = array<i32>} : memref<128x32xf32, #tpu.memory_space<vmem>>, vector<1x32xf32>,
    %c1_i32 = arith.constant 1 : i32
    %81 = vector.broadcast %c1_i32 : i32 to vector<1x128xi32>
    %82 = arith.cmpi eq, %2, %81 : vector<1x128xi32>
    %83 = arith.index_cast %77 : i32 to index
    %84 = memref.load %arg3[%83] : memref<16xf32, #tpu.memory_space<smem>>
    %cst_50 = arith.constant 0.000000e+00 : f32
    %85 = vector.broadcast %84 : f32 to vector<1x128xf32>
    %86 = vector.broadcast %cst_50 : f32 to vector<1x128xf32>
    %87 = arith.select %82, %85, %86 : vector<1x128xi1>, vector<1x128xf32>
    %88 = arith.addf %76, %87 : vector<1x128xf32>
    %c0_51 = arith.constant 0 : index
    %c2_52 = arith.constant 2 : index
    %89 = memref.load %arg2[%c0_51, %c2_52] : memref<2x4xi32, #tpu.memory_space<smem>>
    %90 = arith.index_cast %89 : i32 to index
    %c0_53 = arith.constant 0 : index
    %91 = vector.load %arg6[%90, %c0_53] : memref<16x32xf32, #tpu.memory_space<vmem>>, vector<1x32xf32>
    %c2_54 = arith.constant 2 : index
    %c0_55 = arith.constant 0 : index
    %92 = vector.load %arg8[%c2_54, %c0_55] : memref<128x32xf32, #tpu.memory_space<vmem>>, vector<1x32xf32>
    tpu.vector_store %arg8[%c2_54, %c0_55], %91 {strides = array<i32>} : memref<128x32xf32, #tpu.memory_space<vmem>>, vector<1x32xf32>,
    %c2_i32 = arith.constant 2 : i32
    %93 = vector.broadcast %c2_i32 : i32 to vector<1x128xi32>
    %94 = arith.cmpi eq, %2, %93 : vector<1x128xi32>
    %95 = arith.index_cast %89 : i32 to index
    %96 = memref.load %arg3[%95] : memref<16xf32, #tpu.memory_space<smem>>
    %cst_56 = arith.constant 0.000000e+00 : f32
    %97 = vector.broadcast %96 : f32 to vector<1x128xf32>
    %98 = vector.broadcast %cst_56 : f32 to vector<1x128xf32>
    %99 = arith.select %94, %97, %98 : vector<1x128xi1>, vector<1x128xf32>
    %100 = arith.addf %88, %99 : vector<1x128xf32>
    %c0_57 = arith.constant 0 : index
    %c3_58 = arith.constant 3 : index
    %101 = memref.load %arg2[%c0_57, %c3_58] : memref<2x4xi32, #tpu.memory_space<smem>>
    %102 = arith.index_cast %101 : i32 to index
    %c0_59 = arith.constant 0 : index
    %103 = vector.load %arg6[%102, %c0_59] : memref<16x32xf32, #tpu.memory_space<vmem>>, vector<1x32xf32>
    %c3_60 = arith.constant 3 : index
    %c0_61 = arith.constant 0 : index
    %104 = vector.load %arg8[%c3_60, %c0_61] : memref<128x32xf32, #tpu.memory_space<vmem>>, vector<1x32xf32>
    tpu.vector_store %arg8[%c3_60, %c0_61], %103 {strides = array<i32>} : memref<128x32xf32, #tpu.memory_space<vmem>>, vector<1x32xf32>,
    %c3_i32 = arith.constant 3 : i32
    %105 = vector.broadcast %c3_i32 : i32 to vector<1x128xi32>
    %106 = arith.cmpi eq, %2, %105 : vector<1x128xi32>
    %107 = arith.index_cast %101 : i32 to index
    %108 = memref.load %arg3[%107] : memref<16xf32, #tpu.memory_space<smem>>
    %cst_62 = arith.constant 0.000000e+00 : f32
    %109 = vector.broadcast %108 : f32 to vector<1x128xf32>
    %110 = vector.broadcast %cst_62 : f32 to vector<1x128xf32>
    %111 = arith.select %106, %109, %110 : vector<1x128xi1>, vector<1x128xf32>
    %112 = arith.addf %100, %111 : vector<1x128xf32>
    %c0_63 = arith.constant 0 : index
    %c0_64 = arith.constant 0 : index
    %113 = vector.load %arg8[%c0_63, %c0_64] : memref<128x32xf32, #tpu.memory_space<vmem>>, vector<128x32xf32>
    %114 = tpu.transpose %113, [1, 0] : vector<128x32xf32> -> vector<32x128xf32>
    %cst_65 = arith.constant dense<0.000000e+00> : vector<1x128xf32>
    %115 = tpu.matmul %63, %114, %cst_65 {dimension_numbers = #tpu.dot_dimension_numbers<[1], [0], [0], [1], [0, 0, 1, 1], [], []>} : vector<1x32xf32>, vector<32x128xf32>, vector<1x128xf32> -> vector<1x128xf32>
    %116 = arith.addf %115, %112 : vector<1x128xf32>
    %c0_i32_66 = arith.constant 0 : i32
    %117 = vector.broadcast %c0_i32_66 : i32 to vector<2x128xi32>
    %118 = arith.cmpi eq, %3, %117 : vector<2x128xi32>
    %cst_67 = arith.constant 0.000000e+00 : f32
    %119 = vector.shape_cast %116 : vector<1x128xf32> to vector<1x128xf32>
    %120 = vector.broadcast %119 : vector<1x128xf32> to vector<2x128xf32>
    %121 = vector.broadcast %cst_67 : f32 to vector<2x128xf32>
    %122 = arith.select %118, %120, %121 : vector<2x128xi1>, vector<2x128xf32>
    %123 = arith.addf %4, %122 : vector<2x128xf32>
    %c0_68 = arith.constant 0 : index
    %c0_69 = arith.constant 0 : index
    %124 = vector.load %arg5[%c0_68, %c0_69] : memref<1x32xf32, #tpu.memory_space<vmem>>, vector<1x32xf32>
    %c1_70 = arith.constant 1 : index
    %c0_71 = arith.constant 0 : index
    %125 = memref.load %arg1[%c1_70, %c0_71] : memref<2x8xi32, #tpu.memory_space<smem>>
    %c1_72 = arith.constant 1 : index
    %c0_73 = arith.constant 0 : index
    %126 = memref.load %arg0[%c1_72, %c0_73] : memref<2x8xf32, #tpu.memory_space<smem>>
    %127 = arith.index_cast %125 : i32 to index
    %c0_74 = arith.constant 0 : index
    %128 = vector.load %arg4[%127, %c0_74] : memref<128x32xf32, #tpu.memory_space<vmem>>, vector<1x32xf32>
    %129 = vector.broadcast %126 : f32 to vector<1x32xf32>
    %130 = arith.mulf %129, %128 : vector<1x32xf32>
    %131 = arith.addf %124, %130 : vector<1x32xf32>
    %c1_75 = arith.constant 1 : index
    %c1_76 = arith.constant 1 : index
    %132 = memref.load %arg1[%c1_75, %c1_76] : memref<2x8xi32, #tpu.memory_space<smem>>
    %c1_77 = arith.constant 1 : index
    %c1_78 = arith.constant 1 : index
    %133 = memref.load %arg0[%c1_77, %c1_78] : memref<2x8xf32, #tpu.memory_space<smem>>
    %134 = arith.index_cast %132 : i32 to index
    %c0_79 = arith.constant 0 : index
    %135 = vector.load %arg4[%134, %c0_79] : memref<128x32xf32, #tpu.memory_space<vmem>>, vector<1x32xf32>
    %136 = vector.broadcast %133 : f32 to vector<1x32xf32>
    %137 = arith.mulf %136, %135 : vector<1x32xf32>
    %138 = arith.addf %131, %137 : vector<1x32xf32>
    %c1_80 = arith.constant 1 : index
    %c2_81 = arith.constant 2 : index
    %139 = memref.load %arg1[%c1_80, %c2_81] : memref<2x8xi32, #tpu.memory_space<smem>>
    %c1_82 = arith.constant 1 : index
    %c2_83 = arith.constant 2 : index
    %140 = memref.load %arg0[%c1_82, %c2_83] : memref<2x8xf32, #tpu.memory_space<smem>>
    %141 = arith.index_cast %139 : i32 to index
    %c0_84 = arith.constant 0 : index
    %142 = vector.load %arg4[%141, %c0_84] : memref<128x32xf32, #tpu.memory_space<vmem>>, vector<1x32xf32>
    %143 = vector.broadcast %140 : f32 to vector<1x32xf32>
    %144 = arith.mulf %143, %142 : vector<1x32xf32>
    %145 = arith.addf %138, %144 : vector<1x32xf32>
    %c1_85 = arith.constant 1 : index
    %c3_86 = arith.constant 3 : index
    %146 = memref.load %arg1[%c1_85, %c3_86] : memref<2x8xi32, #tpu.memory_space<smem>>
    %c1_87 = arith.constant 1 : index
    %c3_88 = arith.constant 3 : index
    %147 = memref.load %arg0[%c1_87, %c3_88] : memref<2x8xf32, #tpu.memory_space<smem>>
    %148 = arith.index_cast %146 : i32 to index
    %c0_89 = arith.constant 0 : index
    %149 = vector.load %arg4[%148, %c0_89] : memref<128x32xf32, #tpu.memory_space<vmem>>, vector<1x32xf32>
    %150 = vector.broadcast %147 : f32 to vector<1x32xf32>
    %151 = arith.mulf %150, %149 : vector<1x32xf32>
    %152 = arith.addf %145, %151 : vector<1x32xf32>
    %c1_90 = arith.constant 1 : index
    %c4_91 = arith.constant 4 : index
    %153 = memref.load %arg1[%c1_90, %c4_91] : memref<2x8xi32, #tpu.memory_space<smem>>
    %c1_92 = arith.constant 1 : index
    %c4_93 = arith.constant 4 : index
    %154 = memref.load %arg0[%c1_92, %c4_93] : memref<2x8xf32, #tpu.memory_space<smem>>
    %155 = arith.index_cast %153 : i32 to index
    %c0_94 = arith.constant 0 : index
    %156 = vector.load %arg4[%155, %c0_94] : memref<128x32xf32, #tpu.memory_space<vmem>>, vector<1x32xf32>
    %157 = vector.broadcast %154 : f32 to vector<1x32xf32>
    %158 = arith.mulf %157, %156 : vector<1x32xf32>
    %159 = arith.addf %152, %158 : vector<1x32xf32>
    %c1_95 = arith.constant 1 : index
    %c5_96 = arith.constant 5 : index
    %160 = memref.load %arg1[%c1_95, %c5_96] : memref<2x8xi32, #tpu.memory_space<smem>>
    %c1_97 = arith.constant 1 : index
    %c5_98 = arith.constant 5 : index
    %161 = memref.load %arg0[%c1_97, %c5_98] : memref<2x8xf32, #tpu.memory_space<smem>>
    %162 = arith.index_cast %160 : i32 to index
    %c0_99 = arith.constant 0 : index
    %163 = vector.load %arg4[%162, %c0_99] : memref<128x32xf32, #tpu.memory_space<vmem>>, vector<1x32xf32>
    %164 = vector.broadcast %161 : f32 to vector<1x32xf32>
    %165 = arith.mulf %164, %163 : vector<1x32xf32>
    %166 = arith.addf %159, %165 : vector<1x32xf32>
    %c1_100 = arith.constant 1 : index
    %c6_101 = arith.constant 6 : index
    %167 = memref.load %arg1[%c1_100, %c6_101] : memref<2x8xi32, #tpu.memory_space<smem>>
    %c1_102 = arith.constant 1 : index
    %c6_103 = arith.constant 6 : index
    %168 = memref.load %arg0[%c1_102, %c6_103] : memref<2x8xf32, #tpu.memory_space<smem>>
    %169 = arith.index_cast %167 : i32 to index
    %c0_104 = arith.constant 0 : index
    %170 = vector.load %arg4[%169, %c0_104] : memref<128x32xf32, #tpu.memory_space<vmem>>, vector<1x32xf32>
    %171 = vector.broadcast %168 : f32 to vector<1x32xf32>
    %172 = arith.mulf %171, %170 : vector<1x32xf32>
    %173 = arith.addf %166, %172 : vector<1x32xf32>
    %c1_105 = arith.constant 1 : index
    %c7_106 = arith.constant 7 : index
    %174 = memref.load %arg1[%c1_105, %c7_106] : memref<2x8xi32, #tpu.memory_space<smem>>
    %c1_107 = arith.constant 1 : index
    %c7_108 = arith.constant 7 : index
    %175 = memref.load %arg0[%c1_107, %c7_108] : memref<2x8xf32, #tpu.memory_space<smem>>
    %176 = arith.index_cast %174 : i32 to index
    %c0_109 = arith.constant 0 : index
    %177 = vector.load %arg4[%176, %c0_109] : memref<128x32xf32, #tpu.memory_space<vmem>>, vector<1x32xf32>
    %178 = vector.broadcast %175 : f32 to vector<1x32xf32>
    %179 = arith.mulf %178, %177 : vector<1x32xf32>
    %180 = arith.addf %173, %179 : vector<1x32xf32>
    %cst_110 = arith.constant 0.000000e+00 : f32
    %181 = vector.broadcast %cst_110 : f32 to vector<1x32xf32>
    %182 = arith.maximumf %180, %181 : vector<1x32xf32>
    %cst_111 = arith.constant 0.000000e+00 : f32
    %183 = vector.broadcast %cst_111 : f32 to vector<1x128xf32>
    %c1_112 = arith.constant 1 : index
    %c0_113 = arith.constant 0 : index
    %184 = memref.load %arg2[%c1_112, %c0_113] : memref<2x4xi32, #tpu.memory_space<smem>>
    %185 = arith.index_cast %184 : i32 to index
    %c0_114 = arith.constant 0 : index
    %186 = vector.load %arg6[%185, %c0_114] : memref<16x32xf32, #tpu.memory_space<vmem>>, vector<1x32xf32>
    %c0_115 = arith.constant 0 : index
    %c0_116 = arith.constant 0 : index
    %187 = vector.load %arg8[%c0_115, %c0_116] : memref<128x32xf32, #tpu.memory_space<vmem>>, vector<1x32xf32>
    tpu.vector_store %arg8[%c0_115, %c0_116], %186 {strides = array<i32>} : memref<128x32xf32, #tpu.memory_space<vmem>>, vector<1x32xf32>,
    %c0_i32_117 = arith.constant 0 : i32
    %188 = vector.broadcast %c0_i32_117 : i32 to vector<1x128xi32>
    %189 = arith.cmpi eq, %2, %188 : vector<1x128xi32>
    %190 = arith.index_cast %184 : i32 to index
    %191 = memref.load %arg3[%190] : memref<16xf32, #tpu.memory_space<smem>>
    %cst_118 = arith.constant 0.000000e+00 : f32
    %192 = vector.broadcast %191 : f32 to vector<1x128xf32>
    %193 = vector.broadcast %cst_118 : f32 to vector<1x128xf32>
    %194 = arith.select %189, %192, %193 : vector<1x128xi1>, vector<1x128xf32>
    %195 = arith.addf %183, %194 : vector<1x128xf32>
    %c1_119 = arith.constant 1 : index
    %c1_120 = arith.constant 1 : index
    %196 = memref.load %arg2[%c1_119, %c1_120] : memref<2x4xi32, #tpu.memory_space<smem>>
    %197 = arith.index_cast %196 : i32 to index
    %c0_121 = arith.constant 0 : index
    %198 = vector.load %arg6[%197, %c0_121] : memref<16x32xf32, #tpu.memory_space<vmem>>, vector<1x32xf32>
    %c1_122 = arith.constant 1 : index
    %c0_123 = arith.constant 0 : index
    %199 = vector.load %arg8[%c1_122, %c0_123] : memref<128x32xf32, #tpu.memory_space<vmem>>, vector<1x32xf32>
    tpu.vector_store %arg8[%c1_122, %c0_123], %198 {strides = array<i32>} : memref<128x32xf32, #tpu.memory_space<vmem>>, vector<1x32xf32>,
    %c1_i32_124 = arith.constant 1 : i32
    %200 = vector.broadcast %c1_i32_124 : i32 to vector<1x128xi32>
    %201 = arith.cmpi eq, %2, %200 : vector<1x128xi32>
    %202 = arith.index_cast %196 : i32 to index
    %203 = memref.load %arg3[%202] : memref<16xf32, #tpu.memory_space<smem>>
    %cst_125 = arith.constant 0.000000e+00 : f32
    %204 = vector.broadcast %203 : f32 to vector<1x128xf32>
    %205 = vector.broadcast %cst_125 : f32 to vector<1x128xf32>
    %206 = arith.select %201, %204, %205 : vector<1x128xi1>, vector<1x128xf32>
    %207 = arith.addf %195, %206 : vector<1x128xf32>
    %c1_126 = arith.constant 1 : index
    %c2_127 = arith.constant 2 : index
    %208 = memref.load %arg2[%c1_126, %c2_127] : memref<2x4xi32, #tpu.memory_space<smem>>
    %209 = arith.index_cast %208 : i32 to index
    %c0_128 = arith.constant 0 : index
    %210 = vector.load %arg6[%209, %c0_128] : memref<16x32xf32, #tpu.memory_space<vmem>>, vector<1x32xf32>
    %c2_129 = arith.constant 2 : index
    %c0_130 = arith.constant 0 : index
    %211 = vector.load %arg8[%c2_129, %c0_130] : memref<128x32xf32, #tpu.memory_space<vmem>>, vector<1x32xf32>
    tpu.vector_store %arg8[%c2_129, %c0_130], %210 {strides = array<i32>} : memref<128x32xf32, #tpu.memory_space<vmem>>, vector<1x32xf32>,
    %c2_i32_131 = arith.constant 2 : i32
    %212 = vector.broadcast %c2_i32_131 : i32 to vector<1x128xi32>
    %213 = arith.cmpi eq, %2, %212 : vector<1x128xi32>
    %214 = arith.index_cast %208 : i32 to index
    %215 = memref.load %arg3[%214] : memref<16xf32, #tpu.memory_space<smem>>
    %cst_132 = arith.constant 0.000000e+00 : f32
    %216 = vector.broadcast %215 : f32 to vector<1x128xf32>
    %217 = vector.broadcast %cst_132 : f32 to vector<1x128xf32>
    %218 = arith.select %213, %216, %217 : vector<1x128xi1>, vector<1x128xf32>
    %219 = arith.addf %207, %218 : vector<1x128xf32>
    %c1_133 = arith.constant 1 : index
    %c3_134 = arith.constant 3 : index
    %220 = memref.load %arg2[%c1_133, %c3_134] : memref<2x4xi32, #tpu.memory_space<smem>>
    %221 = arith.index_cast %220 : i32 to index
    %c0_135 = arith.constant 0 : index
    %222 = vector.load %arg6[%221, %c0_135] : memref<16x32xf32, #tpu.memory_space<vmem>>, vector<1x32xf32>
    %c3_136 = arith.constant 3 : index
    %c0_137 = arith.constant 0 : index
    %223 = vector.load %arg8[%c3_136, %c0_137] : memref<128x32xf32, #tpu.memory_space<vmem>>, vector<1x32xf32>
    tpu.vector_store %arg8[%c3_136, %c0_137], %222 {strides = array<i32>} : memref<128x32xf32, #tpu.memory_space<vmem>>, vector<1x32xf32>,
    %c3_i32_138 = arith.constant 3 : i32
    %224 = vector.broadcast %c3_i32_138 : i32 to vector<1x128xi32>
    %225 = arith.cmpi eq, %2, %224 : vector<1x128xi32>
    %226 = arith.index_cast %220 : i32 to index
    %227 = memref.load %arg3[%226] : memref<16xf32, #tpu.memory_space<smem>>
    %cst_139 = arith.constant 0.000000e+00 : f32
    %228 = vector.broadcast %227 : f32 to vector<1x128xf32>
    %229 = vector.broadcast %cst_139 : f32 to vector<1x128xf32>
    %230 = arith.select %225, %228, %229 : vector<1x128xi1>, vector<1x128xf32>
    %231 = arith.addf %219, %230 : vector<1x128xf32>
    %c0_140 = arith.constant 0 : index
    %c0_141 = arith.constant 0 : index
    %232 = vector.load %arg8[%c0_140, %c0_141] : memref<128x32xf32, #tpu.memory_space<vmem>>, vector<128x32xf32>
    %233 = tpu.transpose %232, [1, 0] : vector<128x32xf32> -> vector<32x128xf32>
    %cst_142 = arith.constant dense<0.000000e+00> : vector<1x128xf32>
    %234 = tpu.matmul %182, %233, %cst_142 {dimension_numbers = #tpu.dot_dimension_numbers<[1], [0], [0], [1], [0, 0, 1, 1], [], []>} : vector<1x32xf32>, vector<32x128xf32>, vector<1x128xf32> -> vector<1x128xf32>
    %235 = arith.addf %234, %231 : vector<1x128xf32>
    %c1_i32_143 = arith.constant 1 : i32
    %236 = vector.broadcast %c1_i32_143 : i32 to vector<2x128xi32>
    %237 = arith.cmpi eq, %3, %236 : vector<2x128xi32>
    %cst_144 = arith.constant 0.000000e+00 : f32
    %238 = vector.shape_cast %235 : vector<1x128xf32> to vector<1x128xf32>
    %239 = vector.broadcast %238 : vector<1x128xf32> to vector<2x128xf32>
    %240 = vector.broadcast %cst_144 : f32 to vector<2x128xf32>
    %241 = arith.select %237, %239, %240 : vector<2x128xi1>, vector<2x128xf32>
    %242 = arith.addf %123, %241 : vector<2x128xf32>
    %c0_145 = arith.constant 0 : index
    %c0_146 = arith.constant 0 : index
    %243 = vector.load %arg7[%c0_145, %c0_146] : memref<2x128xf32, #tpu.memory_space<vmem>>, vector<2x128xf32>
    tpu.vector_store %arg7[%c0_145, %c0_146], %242 {strides = array<i32>} : memref<2x128xf32, #tpu.memory_space<vmem>>, vector<2x128xf32>,
    return
  }
}

</mosaic_0001>

<bundles_post_ra>
// kernel: tpu_custom_call.1
= control target key start
LH: loop header
LB: loop body
LE: loop exit
PB: predicated region body
PF: predicated region fallthrough
CT: control target
= control target key end

     0   :  { %s1278_s0 = inlined_call_operand.vmem [shape: f32[2,8], index: 0, kind: input, shape index: {}]   ;;  %s1279_s1 = inlined_call_operand.vmem [shape: s32[2,8], index: 1, kind: input, shape index: {}]   ;;  %s1280_s2 = inlined_call_operand.vmem [shape: s32[2,4], index: 2, kind: input, shape index: {}]   ;;  %s1281_s3 = inlined_call_operand.vmem [shape: f32[16], index: 3, kind: input, shape index: {}]   ;;  %s1282_s4 = inlined_call_operand.vmem [shape: f32[128,32], index: 4, kind: input, shape index: {}]   ;;  %s1283_s5 = inlined_call_operand.vmem [shape: f32[1,32], index: 5, kind: input, shape index: {}]   ;;  %s1284_s6 = inlined_call_operand.vmem [shape: f32[16,32], index: 6, kind: input, shape index: {}]   ;;  %s1285_s7 = inlined_call_operand.hbm [shape: f32[2,128], index: 7, kind: output, shape index: {}]  }
   0x1   :  { %1290 = sst [smem:[#allocation21_spill]] %s1285_s7 }
   0x2   :  { %12 = vsyncpa [#allocation5], 0 }
   0x3   :  { %13 = vsyncpa [#allocation7], 0 }
   0x4   :  { %14 = vsyncpa [#allocation10], 0  ;;  %s32_s26 = sshll.u32 %s1279_s1, 4  ;;  %s33_s26 = int_to_ptr.vmem [resolvable:$true] %s32_s26 }
   0x5   :  { %15 = vsyncpa [#allocation4], 0  ;;  %s22_s29 = sshll.u32 %s1278_s0, 4  ;;  %s793_s30 = scalar_lea.vmem %s33_s26, 32  ;;  %s23_s29 = int_to_ptr.vmem [resolvable:$true] %s22_s29 }
   0x6   :  { %p794_p0 = scmp.ne.s32.totalorder %s33_s26, %s793_s30  ;;  %p798_p1 = scmp.lt.s32.totalorder %s33_s26, %s33_s26 }
   0x7   :  { %p799_p2 = scmp.lt.s32.totalorder %s793_s30, %s793_s30 }
   0x9   :  { %p800_p3 = por %p799_p2, %p798_p1 }
   0xb   :  { %p801_p4 = pnand %p800_p3, %p794_p0 }
   0xd   :  { %804 = shalt.err (!%p801_p4)
}
   0xe   :  { %s869_s8 = smov [#allocation6]   ;;  %s805_s9 = scalar_lea.vmem %s23_s29, 32 }
   0xf   :  { %35 = dma.vmem_to_smem %s33_s26, 32, %s869_s8, [#allocation7]  }
  0x10   :  { %p806_p5 = scmp.ne.s32.totalorder %s23_s29, %s805_s9  ;;  %p810_p6 = scmp.lt.s32.totalorder %s23_s29, %s23_s29 }
  0x11   :  { %p811_p7 = scmp.lt.s32.totalorder %s805_s9, %s805_s9 }
  0x13   :  { %p812_p8 = por %p811_p7, %p810_p6 }
  0x15   :  { %p813_p9 = pnand %p812_p8, %p806_p5 }
  0x17   :  { %816 = shalt.err (!%p813_p9)
}
  0x18   :  { %s870_s1 = smov [#allocation3]   ;;  %s42_s11 = sshll.u32 %s1280_s2, 4  ;;  %s43_s11 = int_to_ptr.vmem [resolvable:$true] %s42_s11 }
  0x19   :  { %25 = dma.vmem_to_smem %s23_s29, 32, %s870_s1, [#allocation5]  }
  0x1a   :  { %s52_s14 = sshll.u32 %s1281_s3, 4  ;;  %s817_s15 = scalar_lea.vmem %s43_s11, 32  ;;  %s53_s14 = int_to_ptr.vmem [resolvable:$true] %s52_s14 }
  0x1b   :  { %p818_p10 = scmp.ne.s32.totalorder %s43_s11, %s817_s15  ;;  %p822_p11 = scmp.lt.s32.totalorder %s43_s11, %s43_s11 }
  0x1c   :  { %p823_p12 = scmp.lt.s32.totalorder %s817_s15, %s817_s15 }
  0x1e   :  { %p824_p13 = por %p823_p12, %p822_p11 }
  0x20   :  { %p825_p0 = pnand %p824_p13, %p818_p10 }
  0x22   :  { %828 = shalt.err (!%p825_p0)
}
  0x23   :  { %s871_s16 = smov [#allocation8]   ;;  %s829_s17 = scalar_lea.vmem %s53_s14, 16 }
  0x24   :  { %45 = dma.vmem_to_smem %s43_s11, 32, %s871_s16, [#allocation7]  }
  0x25   :  { %p830_p1 = scmp.ne.s32.totalorder %s53_s14, %s829_s17  ;;  %p834_p2 = scmp.lt.s32.totalorder %s53_s14, %s53_s14 }
  0x26   :  { %p835_p3 = scmp.lt.s32.totalorder %s829_s17, %s829_s17 }
  0x28   :  { %p836_p4 = por %p835_p3, %p834_p2 }
  0x2a   :  { %p837_p5 = pnand %p836_p4, %p830_p1 }
  0x2c   :  { %840 = shalt.err (!%p837_p5)
}
  0x2d   :  { %s872_s2 = smov [#allocation9]  }
  0x2e   :  { %55 = dma.vmem_to_smem %s53_s14, 16, %s872_s2, [#allocation10]  }
  0x2f   :  { %861 = dma.done.wait [#allocation5], 32  }
  0x30   :  { %862 = vsyncadd [#allocation5], 4294967264 }
  0x31   :  { %863 = dma.done.wait [#allocation7], 64  }
  0x32   :  { %864 = vsyncadd [#allocation7], 4294967232 }
  0x33   :  { %865 = dma.done.wait [#allocation10], 16  }
  0x34   :  { %866 = vsyncadd [#allocation10], 4294967280 }
  0x35   :  { %74 = sfence }
  0x36   :  { %vm75_vm0 = vcmask 261120   ;;  %s928_s3 = sld [smem:[#allocation8]]  ;;  %v873_v0 = vmov 0.0   ;;  %vm874_vm1 = vmmov 0   ;;  %vm157_vm2 = vcmask 253952  }
  0x37   :  { %716 = vmatprep.subr.mxu0 %v873_v0  ;;  %751 = vmatprep.subr.mxu1 %v873_v0  ;;  %91 = vst.msk [vmem:[#allocation2 + $0x78] sm:$0xff] %vm75_vm0, %v873_v0  ;;  %76 = vst.msk [vmem:[#allocation2] sm:$0xff] %vm75_vm0, %v873_v0  ;;  %s964_s18 = sld [smem:[#allocation8 + $0x1]]  ;;  %v96_v20 = vld [vmem:[%s1283_s5] sm:$0x1]  ;;  %v92_v39 = vlaneseq }
  0x38   :  { %77 = vst.msk [vmem:[#allocation2 + $0x8] sm:$0xff] %vm75_vm0, %v873_v0  ;;  %78 = vst.msk [vmem:[#allocation2 + $0x10] sm:$0xff] %vm75_vm0, %v873_v0  ;;  %s966_s19 = sld [smem:[#allocation8 + $0x2]]  ;;  %748 = vmatprep.mubr.msk.f32.mxu0 %vm874_vm1, %v873_v0  ;;  %783 = vmatprep.mubr.msk.f32.mxu1 %vm874_vm1, %v873_v0  ;;  %v335_v23 = vld [vmem:[%s1283_s5] sm:$0x1] }
  0x39   :  { %79 = vst.msk [vmem:[#allocation2 + $0x18] sm:$0xff] %vm75_vm0, %v873_v0  ;;  %80 = vst.msk [vmem:[#allocation2 + $0x20] sm:$0xff] %vm75_vm0, %v873_v0  ;;  %s970_s20 = sld [smem:[#allocation8 + $0x3]]  ;;  %v1165_v49 = vand.u32 127, %v92_v39 }
  0x3a   :  { %81 = vst.msk [vmem:[#allocation2 + $0x28] sm:$0xff] %vm75_vm0, %v873_v0  ;;  %82 = vst.msk [vmem:[#allocation2 + $0x30] sm:$0xff] %vm75_vm0, %v873_v0  ;;  %s972_s21 = sld [smem:[#allocation8 + $0x80]] }
  0x3b   :  { %83 = vst.msk [vmem:[#allocation2 + $0x38] sm:$0xff] %vm75_vm0, %v873_v0  ;;  %84 = vst.msk [vmem:[#allocation2 + $0x40] sm:$0xff] %vm75_vm0, %v873_v0  ;;  %s978_s25 = sld [smem:[#allocation8 + $0x81]]  ;;  %vm159_vm3 = vcmp.eq.s32.totalorder %v1165_v49, 0  ;;  %vm168_vm4 = vcmp.eq.s32.totalorder %v1165_v49, 1  ;;  %vm177_vm5 = vcmp.eq.s32.totalorder %v1165_v49, 2 }
  0x3c   :  { %85 = vst.msk [vmem:[#allocation2 + $0x48] sm:$0xff] %vm75_vm0, %v873_v0  ;;  %86 = vst.msk [vmem:[#allocation2 + $0x50] sm:$0xff] %vm75_vm0, %v873_v0  ;;  %s155_s24 = scalar_lea.vmem %s1284_s6, %s928_s3  ;;  %s980_s26 = sld [smem:[#allocation8 + $0x82]]  ;;  %vm186_vm6 = vcmp.eq.s32.totalorder %v1165_v49, 3 }
  0x3d   :  { %87 = vst.msk [vmem:[#allocation2 + $0x58] sm:$0xff] %vm75_vm0, %v873_v0  ;;  %88 = vst.msk [vmem:[#allocation2 + $0x60] sm:$0xff] %vm75_vm0, %v873_v0  ;;  %v156_v1 = vld [vmem:[%s155_s24] sm:$0x1]  ;;  %s983_s27 = sld [smem:[#allocation8 + $0x83]]  ;;  %s165_s30 = scalar_lea.vmem %s1284_s6, %s964_s18 }
  0x3e   :  { %89 = vst.msk [vmem:[#allocation2 + $0x68] sm:$0xff] %vm75_vm0, %v873_v0  ;;  %90 = vst.msk [vmem:[#allocation2 + $0x70] sm:$0xff] %vm75_vm0, %v873_v0  ;;  %v206_v2 = vld [vmem:[#allocation2 + $0x78] sm:$0xff]  ;;  %s174_s1 = scalar_lea.vmem %s1284_s6, %s966_s19  ;;  %s1001_s12 = sld [smem:[#allocation6]]  ;;  %v166_v4 = vld [vmem:[%s165_s30] sm:$0x1] }
  0x3f   :  { %158 = vst.msk [vmem:[#allocation2] sm:$0x1] %vm157_vm2, %v156_v1  ;;  %717 = vmatpush3.xpose.msk.msra.mxu0 %vm75_vm0, %v206_v2  ;;  %752 = vmatpush3.xpose.msk.msra.mxu1 %vm75_vm0, %v206_v2  ;;  %s183_s11 = scalar_lea.vmem %s1284_s6, %s970_s20  ;;  %s1003_s13 = sld [smem:[#allocation3]]  ;;  %v175_v5 = vld [vmem:[%s174_s1] sm:$0x1] }
  0x40   :  { %1291 = sst [smem:[#allocation16_spill]] %s972_s21  ;;  %718 = vmatprep.subr.mxu0 %v873_v0  ;;  %753 = vmatprep.subr.mxu1 %v873_v0  ;;  %v184_v6 = vld [vmem:[%s183_s11] sm:$0x1]  ;;  %167 = vst.msk [vmem:[#allocation2 + $0x1] sm:$0x1] %vm157_vm2, %v166_v4  ;;  %s394_s16 = scalar_lea.vmem %s1284_s6, %s972_s21 }
  0x41   :  { %1292 = sst [smem:[#allocation17_spill]] %s978_s25  ;;  %176 = vst.msk [vmem:[#allocation2 + $0x2] sm:$0x1] %vm157_vm2, %v175_v5  ;;  %185 = vst.msk [vmem:[#allocation2 + $0x3] sm:$0x1] %vm157_vm2, %v184_v6  ;;  %s402_s23 = scalar_lea.vmem %s1284_s6, %s978_s25  ;;  %v197_v48 = vld [vmem:[#allocation2 + $0x30] sm:$0xff] }
  0x42   :  { %1293 = sst [smem:[#allocation18_spill]] %s980_s26  ;;  %s410_s30 = scalar_lea.vmem %s1284_s6, %s980_s26  ;;  %v395_v9 = vld [vmem:[%s394_s16] sm:$0x1]  ;;  %v198_v38 = vld [vmem:[#allocation2 + $0x38] sm:$0xff]  ;;  %v196_v58 = vld [vmem:[#allocation2 + $0x28] sm:$0xff] }
  0x43   :  { %1294 = sst [smem:[#allocation19_spill]] %s983_s27  ;;  %s418_s1 = scalar_lea.vmem %s1284_s6, %s983_s27  ;;  %v403_v10 = vld [vmem:[%s402_s23] sm:$0x1]  ;;  %v201_v15 = vld [vmem:[#allocation2 + $0x50] sm:$0xff]  ;;  %v200_v18 = vld [vmem:[#allocation2 + $0x48] sm:$0xff] }
  0x44   :  { %s1016_s17 = sld [smem:[#allocation6 + $0x1]]  ;;  %v203_v8 = vld [vmem:[#allocation2 + $0x60] sm:$0xff]  ;;  %v202_v14 = vld [vmem:[#allocation2 + $0x58] sm:$0xff]  ;;  %s99_s28 = scalar_lea.vmem %s1282_s4, %s1001_s12 }
  0x45   :  { %v205_v3 = vld [vmem:[#allocation2 + $0x70] sm:$0xff]  ;;  %v204_v7 = vld [vmem:[#allocation2 + $0x68] sm:$0xff]  ;;  %s1022_s24 = sld [smem:[#allocation3 + $0x1]]  ;;  %v411_v11 = vld [vmem:[%s410_s30] sm:$0x1]  ;;  %v101_v17 = vstv %s1003_s13 }
  0x46   :  { %719 = vmatpush3.xpose.msk.msra.mxu0 %vm75_vm0, %v205_v3  ;;  %754 = vmatpush3.xpose.msk.msra.mxu1 %vm75_vm0, %v205_v3  ;;  %s1034_s0 = sld [smem:[#allocation6 + $0x2]]  ;;  %v419_v12 = vld [vmem:[%s418_s1] sm:$0x1] }
  0x47   :  { %720 = vmatprep.subr.mxu0 %v873_v0  ;;  %755 = vmatprep.subr.mxu1 %v873_v0  ;;  %s1038_s10 = sld [smem:[#allocation3 + $0x2]]  ;;  %v100_v16 = vld [vmem:[%s99_s28] sm:$0x1] }
  0x48   :  { %s1040_s11 = sld [smem:[#allocation6 + $0x3]]  ;;  %v1046_v13 = vld [vmem:[#allocation2] sm:$0xff]  ;;  %v102_v19 = vmul.f32 %v101_v17, %v100_v16 }
  0x49   :  { %s1042_s6 = sld [smem:[#allocation3 + $0x3]]  ;;  %396 = vst.msk [vmem:[#allocation2] sm:$0x1] %vm157_vm2, %v395_v9  ;;  %404 = vst.msk [vmem:[#allocation2 + $0x1] sm:$0x1] %vm157_vm2, %v403_v10  ;;  %v199_v26 = vld [vmem:[#allocation2 + $0x40] sm:$0xff] }
  0x4a   :  { %721 = vmatpush3.xpose.msk.msra.mxu0 %vm75_vm0, %v204_v7  ;;  %756 = vmatpush3.xpose.msk.msra.mxu1 %vm75_vm0, %v204_v7  ;;  %s1048_s14 = sld [smem:[#allocation6 + $0x4]]  ;;  %412 = vst.msk [vmem:[#allocation2 + $0x2] sm:$0x1] %vm157_vm2, %v411_v11  ;;  %420 = vst.msk [vmem:[#allocation2 + $0x3] sm:$0x1] %vm157_vm2, %v419_v12  ;;  %s106_s22 = scalar_lea.vmem %s1282_s4, %s1016_s17  ;;  %v103_v28 = vadd.f32 %v102_v19, %v96_v20  ;;  %v195_v7 = vld [vmem:[#allocation2 + $0x20] sm:$0xff] }
  0x4b   :  { %722 = vmatprep.subr.mxu0 %v873_v0  ;;  %757 = vmatprep.subr.mxu1 %v873_v0  ;;  %s1056_s15 = sld [smem:[#allocation3 + $0x4]]  ;;  %v107_v21 = vld [vmem:[%s106_s22] sm:$0x1]  ;;  %v108_v22 = vstv %s1022_s24 }
  0x4c   :  { %s1058_s16 = sld [smem:[#allocation6 + $0x5]]  ;;  %v109_v29 = vmul.f32 %v108_v22, %v107_v21 }
  0x4d   :  { %s1060_s2 = sld [smem:[#allocation3 + $0x5]]  ;;  %v115_v33 = vstv %s1038_s10 }
  0x4e   :  { %723 = vmatpush3.xpose.msk.msra.mxu0 %vm75_vm0, %v203_v8  ;;  %758 = vmatpush3.xpose.msk.msra.mxu1 %vm75_vm0, %v203_v8  ;;  %s1068_s29 = sld [smem:[#allocation6 + $0x6]]  ;;  %v110_v40 = vadd.f32 %v109_v29, %v103_v28 }
  0x4f   :  { %724 = vmatprep.subr.mxu0 %v873_v0  ;;  %759 = vmatprep.subr.mxu1 %v873_v0  ;;  %s645_s30 = sld [smem:[#allocation6 + $0x80]]  ;;  %v122_v43 = vstv %s1042_s6 }
  0x50   :  { %s646_s8 = sld [smem:[#allocation3 + $0x80]]  ;;  %s127_s21 = scalar_lea.vmem %s1282_s4, %s1048_s14 }
  0x51   :  { %s1073_s9 = sld [smem:[#allocation6 + $0x81]]  ;;  %v128_v52 = vld [vmem:[%s127_s21] sm:$0x1]  ;;  %v129_v53 = vstv %s1056_s15 }
  0x52   :  { %725 = vmatpush3.xpose.msk.msra.mxu0 %vm75_vm0, %v202_v14  ;;  %760 = vmatpush3.xpose.msk.msra.mxu1 %vm75_vm0, %v202_v14  ;;  %s1081_s23 = sld [smem:[#allocation3 + $0x81]]  ;;  %v130_v60 = vmul.f32 %v129_v53, %v128_v52 }
  0x53   :  { %726 = vmatprep.subr.mxu0 %v873_v0  ;;  %761 = vmatprep.subr.mxu1 %v873_v0  ;;  %s1085_s28 = sld [smem:[#allocation6 + $0x82]]  ;;  %v136_v2 = vstv %s1060_s2 }
  0x54   :  { %1295 = sst [smem:[#allocation20_spill]] %s1068_s29  ;;  %s113_s29 = scalar_lea.vmem %s1282_s4, %s1034_s0 }
  0x55   :  { %s1087_s13 = sld [smem:[#allocation3 + $0x82]]  ;;  %s338_s12 = scalar_lea.vmem %s1282_s4, %s645_s30  ;;  %v114_v32 = vld [vmem:[%s113_s29] sm:$0x1] }
  0x56   :  { %727 = vmatpush3.xpose.msk.msra.mxu0 %vm75_vm0, %v201_v15  ;;  %762 = vmatpush3.xpose.msk.msra.mxu1 %vm75_vm0, %v201_v15  ;;  %s1096_s26 = sld [smem:[#allocation6 + $0x83]]  ;;  %v339_v24 = vld [vmem:[%s338_s12] sm:$0x1]  ;;  %v340_v25 = vstv %s646_s8  ;;  %v116_v41 = vmul.f32 %v115_v33, %v114_v32 }
  0x57   :  { %728 = vmatprep.subr.mxu0 %v873_v0  ;;  %763 = vmatprep.subr.mxu1 %v873_v0  ;;  %s1107_s24 = sld [smem:[#allocation3 + $0x83]]  ;;  %v341_v27 = vmul.f32 %v340_v25, %v339_v24  ;;  %s345_s25 = scalar_lea.vmem %s1282_s4, %s1073_s9  ;;  %v194_v24 = vld [vmem:[#allocation2 + $0x18] sm:$0xff] }
  0x58   :  { %s1115_s0 = sld [smem:[#allocation6 + $0x84]]  ;;  %v346_v30 = vld [vmem:[%s345_s25] sm:$0x1]  ;;  %v347_v31 = vstv %s1081_s23  ;;  %s120_s23 = scalar_lea.vmem %s1282_s4, %s1040_s11  ;;  %v117_v50 = vadd.f32 %v116_v41, %v110_v40  ;;  %v192_v40 = vld [vmem:[#allocation2 + $0x8] sm:$0xff] }
  0x59   :  { %s1117_s5 = sld [smem:[#allocation3 + $0x6]]  ;;  %v342_v34 = vadd.f32 %v341_v27, %v335_v23  ;;  %v348_v35 = vmul.f32 %v347_v31, %v346_v30  ;;  %s352_s9 = scalar_lea.vmem %s1282_s4, %s1085_s28  ;;  %v121_v42 = vld [vmem:[%s120_s23] sm:$0x1] }
  0x5a   :  { %729 = vmatpush3.xpose.msk.msra.mxu0 %vm75_vm0, %v200_v18  ;;  %764 = vmatpush3.xpose.msk.msra.mxu1 %vm75_vm0, %v200_v18  ;;  %s1121_s8 = sld [smem:[#allocation6 + $0x7]]  ;;  %v353_v36 = vld [vmem:[%s352_s9] sm:$0x1]  ;;  %v123_v51 = vmul.f32 %v122_v43, %v121_v42 }
  0x5b   :  { %730 = vmatprep.subr.mxu0 %v873_v0  ;;  %765 = vmatprep.subr.mxu1 %v873_v0  ;;  %v354_v37 = vstv %s1087_s13  ;;  %s1134_s10 = sld [smem:[#allocation3 + $0x84]]  ;;  %v349_v44 = vadd.f32 %v348_v35, %v342_v34  ;;  %v193_v34 = vld [vmem:[#allocation2 + $0x10] sm:$0xff]  ;;  %v425_v43 = vld [vmem:[#allocation2] sm:$0xff] }
  0x5c   :  { %s359_s7 = scalar_lea.vmem %s1282_s4, %s1096_s26  ;;  %s1142_s27 = sld [smem:[#allocation6 + $0x85]]  ;;  %v355_v45 = vmul.f32 %v354_v37, %v353_v36  ;;  %v124_v59 = vadd.f32 %v123_v51, %v117_v50 }
  0x5d   :  { %s1144_s11 = sld [smem:[#allocation3 + $0x85]]  ;;  %v360_v46 = vld [vmem:[%s359_s7] sm:$0x1]  ;;  %v361_v47 = vstv %s1107_s24 }
  0x5e   :  { %731 = vmatpush3.xpose.msk.msra.mxu0 %vm75_vm0, %v199_v26  ;;  %766 = vmatpush3.xpose.msk.msra.mxu1 %vm75_vm0, %v199_v26  ;;  %s1147_s13 = sld [smem:[#allocation6 + $0x86]]  ;;  %s366_s17 = scalar_lea.vmem %s1282_s4, %s1115_s0  ;;  %v356_v54 = vadd.f32 %v355_v45, %v349_v44  ;;  %v362_v55 = vmul.f32 %v361_v47, %v360_v46  ;;  %v131_v10 = vadd.f32 %v130_v60, %v124_v59 }
  0x5f   :  { %732 = vmatprep.subr.mxu0 %v873_v0  ;;  %767 = vmatprep.subr.mxu1 %v873_v0  ;;  %s1156_s25 = sld [smem:[#allocation3 + $0x86]]  ;;  %v367_v56 = vld [vmem:[%s366_s17] sm:$0x1]  ;;  %v143_v20 = vstv %s1117_s5  ;;  %s875_s0 = smov [#allocation11]  }
  0x60   :  { %s1168_s14 = sld [smem:[#allocation9 + %s928_s3]]  ;;  %s134_s3 = scalar_lea.vmem %s1282_s4, %s1058_s16  ;;  %v363_v62 = vadd.f32 %v362_v55, %v356_v54  ;;  %v95_v55 = vshrl.u32 %v92_v39, 7 }
  0x61   :  { %s1171_s24 = sld [smem:[#allocation9 + %s964_s18]]  ;;  %v368_v57 = vstv %s1134_s10  ;;  %v135_v61 = vld [vmem:[%s134_s3] sm:$0x1]  ;;  %s148_s30 = scalar_lea.vmem %s1282_s4, %s1121_s8 }
  0x62   :  { %733 = vmatpush3.xpose.msk.msra.mxu0 %vm75_vm0, %v198_v38  ;;  %768 = vmatpush3.xpose.msk.msra.mxu1 %vm75_vm0, %v198_v38  ;;  %s1175_s9 = sld [smem:[#allocation9 + %s966_s19]]  ;;  %s373_s15 = scalar_lea.vmem %s1282_s4, %s1142_s27  ;;  %v369_v63 = vmul.f32 %v368_v57, %v367_v56  ;;  %v137_v15 = vmul.f32 %v136_v2, %v135_v61  ;;  %v149_v30 = vld [vmem:[%s148_s30] sm:$0x1]  ;;  %v331_v57 = vsub.s32 0, %v95_v55  ;;  %vm328_vm7 = vcmp.eq.s32.totalorder %v95_v55, 0 }
  0x63   :  { %734 = vmatprep.subr.mxu0 %v873_v0  ;;  %769 = vmatprep.subr.mxu1 %v873_v0  ;;  %s1185_s12 = sld [smem:[#allocation9 + %s970_s20]]  ;;  %v374_v3 = vld [vmem:[%s373_s15] sm:$0x1]  ;;  %v375_v4 = vstv %s1144_s11  ;;  %vm562_vm8 = vcmp.eq.s32.totalorder %v95_v55, 1  ;;  %s576_s1 = sshll.u32 %s875_s0, 4  ;;  %s577_s1 = int_to_ptr.vmem [resolvable:$true] %s576_s1 }
  0x64   :  { %s1193_s23 = sld [smem:[#allocation6 + $0x87]]  ;;  %s380_s11 = scalar_lea.vmem %s1282_s4, %s1147_s13  ;;  %v370_v16 = vadd.f32 %v369_v63, %v363_v62  ;;  %v376_v17 = vmul.f32 %v375_v4, %v374_v3  ;;  %v138_v26 = vadd.f32 %v137_v15, %v131_v10 }
  0x65   :  { %s1198_s20 = sld [smem:[#allocation3 + $0x7]]  ;;  %v381_v21 = vld [vmem:[%s380_s11] sm:$0x1]  ;;  %v382_v22 = vstv %s1156_s25  ;;  %s841_s3 = scalar_lea.vmem %s577_s1, 32 }
  0x66   :  { %735 = vmatpush3.xpose.msk.msra.mxu0 %vm75_vm0, %v197_v48  ;;  %770 = vmatpush3.xpose.msk.msra.mxu1 %vm75_vm0, %v197_v48  ;;  %s1296_s16 = sld [smem:[#allocation20_spill]]  ;;  %v161_v1 = vstv %s1168_s14  ;;  %v377_v28 = vadd.f32 %v376_v17, %v370_v16  ;;  %v383_v29 = vmul.f32 %v382_v22, %v381_v21  ;;  %p842_p6 = scmp.ne.s32.totalorder %s577_s1, %s841_s3 }
  0x67   :  { %736 = vmatprep.subr.mxu0 %v873_v0  ;;  %771 = vmatprep.subr.mxu1 %v873_v0  ;;  %s1206_s10 = sld [smem:[#allocation3 + $0x87]]  ;;  %v162_v5 = vsel %vm159_vm3, %v161_v1, 0.0  ;;  %v170_v6 = vstv %s1171_s24  ;;  %p846_p7 = scmp.lt.s32.totalorder %s577_s1, %s577_s1 }
  0x68   :  { %v171_v8 = vsel %vm168_vm4, %v170_v6, 0.0  ;;  %v179_v9 = vstv %s1175_s9  ;;  %v384_v37 = vadd.f32 %v383_v29, %v377_v28  ;;  %s1298_s5 = sld [smem:[#allocation17_spill]]  ;;  %p847_p8 = scmp.lt.s32.totalorder %s841_s3, %s841_s3 }
  0x69   :  { %v172_v11 = vadd.f32 %v171_v8, %v162_v5  ;;  %v180_v12 = vsel %vm177_vm5, %v179_v9, 0.0  ;;  %v188_v14 = vstv %s1185_s12  ;;  %s1299_s8 = sld [smem:[#allocation18_spill]] }
  0x6a   :  { %737 = vmatpush3.xpose.msk.msra.mxu0 %vm75_vm0, %v196_v58  ;;  %772 = vmatpush3.xpose.msk.msra.mxu1 %vm75_vm0, %v196_v58  ;;  %v189_v18 = vsel %vm186_vm6, %v188_v14, 0.0  ;;  %s387_s22 = scalar_lea.vmem %s1282_s4, %s1193_s23  ;;  %s1300_s25 = sld [smem:[#allocation19_spill]] }
  0x6b   :  { %738 = vmatprep.subr.mxu0 %v873_v0  ;;  %773 = vmatprep.subr.mxu1 %v873_v0  ;;  %v181_v23 = vadd.f32 %v180_v12, %v172_v11  ;;  %v150_v31 = vstv %s1198_s20  ;;  %v388_v32 = vld [vmem:[%s387_s22] sm:$0x1]  ;;  %p848_p9 = por %p847_p8, %p846_p7 }
  0x6c   :  { %s141_s7 = scalar_lea.vmem %s1282_s4, %s1296_s16  ;;  %v151_v36 = vmul.f32 %v150_v31, %v149_v30  ;;  %s1297_s4 = sld [smem:[#allocation16_spill]] }
  0x6d   :  { %v142_v19 = vld [vmem:[%s141_s7] sm:$0x1]  ;;  %v190_v25 = vadd.f32 %v189_v18, %v181_v23  ;;  %v389_v33 = vstv %s1206_s10  ;;  %p849_p10 = pnand %p848_p9, %p842_p6 }
  0x6e   :  { %739 = vmatpush3.xpose.msk.msra.mxu0 %vm75_vm0, %v195_v7  ;;  %774 = vmatpush3.xpose.msk.msra.mxu1 %vm75_vm0, %v195_v7  ;;  %v144_v27 = vmul.f32 %v143_v20, %v142_v19  ;;  %v390_v38 = vmul.f32 %v389_v33, %v388_v32  ;;  %s405_s14 = sld [smem:[#allocation9 + %s1298_s5]] }
  0x6f   :  { %740 = vmatprep.subr.mxu0 %v873_v0  ;;  %775 = vmatprep.subr.mxu1 %v873_v0  ;;  %s413_s24 = sld [smem:[#allocation9 + %s1299_s8]] }
  0x70   :  { %v145_v35 = vadd.f32 %v144_v27, %v138_v26  ;;  %v391_v42 = vadd.f32 %v390_v38, %v384_v37  ;;  %s421_s9 = sld [smem:[#allocation9 + %s1300_s25]] }
  0x72   :  { %741 = vmatpush3.xpose.msk.msra.mxu0 %vm75_vm0, %v194_v24  ;;  %776 = vmatpush3.xpose.msk.msra.mxu1 %vm75_vm0, %v194_v24  ;;  %v152_v41 = vadd.f32 %v151_v36, %v145_v35  ;;  %v392_v45 = vmax.f32 %v391_v42, 0.0  ;;  %s397_s17 = sld [smem:[#allocation9 + %s1297_s4]] }
  0x73   :  { %742 = vmatprep.subr.mxu0 %v873_v0  ;;  %777 = vmatprep.subr.mxu1 %v873_v0 }
  0x74   :  { %v153_v44 = vmax.f32 %v152_v41, 0.0  ;;  %v406_v47 = vstv %s405_s14 }
  0x75   :  { %v407_v48 = vsel %vm168_vm4, %v406_v47, 0.0  ;;  %v414_v50 = vstv %s413_s24 }
  0x76   :  { %743 = vmatpush3.xpose.msk.msra.mxu0 %vm75_vm0, %v193_v34  ;;  %778 = vmatpush3.xpose.msk.msra.mxu1 %vm75_vm0, %v193_v34  ;;  %v415_v51 = vsel %vm177_vm5, %v414_v50, 0.0  ;;  %v422_v52 = vstv %s421_s9 }
  0x77   :  { %744 = vmatprep.subr.mxu0 %v873_v0  ;;  %779 = vmatprep.subr.mxu1 %v873_v0  ;;  %v423_v54 = vsel %vm186_vm6, %v422_v52, 0.0 }
  0x78   :  { %v398_v46 = vstv %s397_s17 }
  0x7a   :  { %745 = vmatpush3.xpose.msk.msra.mxu0 %vm75_vm0, %v192_v40  ;;  %780 = vmatpush3.xpose.msk.msra.mxu1 %vm75_vm0, %v192_v40 }
  0x7b   :  { %746 = vmatprep.subr.mxu0 %v873_v0  ;;  %781 = vmatprep.subr.mxu1 %v873_v0  ;;  %v399_v0 = vsel %vm159_vm3, %v398_v46, 0.0 }
  0x7e   :  { %747 = vmatpush3.xpose.msk.msra.mxu0 %vm75_vm0, %v1046_v13  ;;  %782 = vmatpush3.xpose.msk.msra.mxu1 %vm75_vm0, %v425_v43  ;;  %v408_v13 = vadd.f32 %v407_v48, %v399_v0 }
  0x80   :  { %v416_v53 = vadd.f32 %v415_v51, %v408_v13 }
  0x81   :  { %749 = vmatmul.mubr.msk.f32.vlgmr.msra.gmra.mxu0 %vm75_vm0, %v153_v44  ;;  %784 = vmatmul.mubr.msk.f32.vlgmr.msra.gmra.mxu1 %vm75_vm0, %v392_v45 }
  0x82   :  { %v424_v56 = vadd.f32 %v423_v54, %v416_v53 }
 0x141   :  { %v324_v58 = vpop.f32.mrf.mxu0  ;;  %v558_v59 = vpop.f32.mrf.mxu1 }
 0x142   :  { %v325_v60 = vadd.f32 %v324_v58, %v190_v25  ;;  %v559_v61 = vadd.f32 %v558_v59, %v424_v56 }
 0x143   :  { %v750_v62 = vpop.f32.mrf.mxu0  ;;  %v785_v63 = vpop.f32.mrf.mxu1 }
 0x144   :  { %v332_v1 = vrot.slane %v325_v60, %v331_v57  ;;  %v566_v2 = vrot.slane %v559_v61, %v331_v57 }
 0x146   :  { %v333_v3 = vsel %vm328_vm7, %v332_v1, 0.0  ;;  %v567_v4 = vsel %vm562_vm8, %v566_v2, 0.0 }
 0x147   :  { %v568_v49 = vadd.f32 %v567_v4, %v333_v3 }
 0x149   :  { %569 = vst [vmem:[#allocation11] sm:$0x3] %v568_v49 }
 0x14a   :  { %852 = shalt.err (!%p849_p10)
}
 0x14b   :  { %s1301_s19 = sld [smem:[#allocation21_spill]] }
 0x151   :  { %579 = dma.vmem_to_hbm [thread:$0]  %s577_s1, 32, %s1301_s19, [#allocation4]  }
 0x152   :  { %867 = dma.done.wait [#allocation4], 32  }
 0x153   :  { %868 = vsyncadd [#allocation4], 4294967264 }
 0x154   :  { %583 = vsyncpa [#allocation4], 1 }
 0x155   :  { %584 = vsyncpa [#allocation5], 1 }
 0x156   :  { %585 = vsyncpa [#allocation7], 1 }
 0x157   :  { %586 = vsyncpa [#allocation10], 1 }

</bundles_post_ra>
